<compile_context>
chip_gen: v7x
topology: tpu7x:2x2x1
jax: 0.10.0
libtpu: 0.0.40
codegen_flags: <defaults>
</compile_context>

<pallas_src>
import math

import jax
import jax.numpy as jnp
from jax.experimental import pallas as pl
from jax.experimental.pallas import tpu as pltpu


def _tokenizer_kernel(x_ref, w_ref, b_ref, o_ref):
    # x_ref: (TB, d_numerical)   -- numeric features for this batch tile
    # w_ref: (d_numerical, F*D)  -- banded weights: row g holds weight[g+1, :] in lanes
    #                               (g+1)*D : (g+2)*D and zeros elsewhere
    # b_ref: (1, F*D)            -- bias.reshape(1, F*D) + CLS band (weight[0] in lanes 0:D)
    # o_ref: (TB, F*D)           -- lane-dense output tile
    x = x_ref[...]
    out = jnp.broadcast_to(b_ref[...], o_ref.shape)
    # d_numerical is small and static -> unrolled VPU FMAs; each term is a
    # (TB,1) lane-broadcast times a (1, F*D) sublane-broadcast (both cheap, standard).
    for g in range(x_ref.shape[1]):
        out = out + x[:, g:g + 1] * w_ref[g:g + 1, :]
    o_ref[...] = out.astype(o_ref.dtype)


def tokenizer_forward(
    x_num: jax.Array, weight: jax.Array, bias: jax.Array, *, block_b: int = 1024
) -> jax.Array:
    """x_num: (B, d_numerical); weight/bias: (F, d_token); returns (B, F, d_token)."""
    B, d_numerical = x_num.shape
    F, D = weight.shape
    assert F == d_numerical + 1 and bias.shape == (F, D)
    FD = F * D

    dtype = x_num.dtype
    weight = weight.astype(dtype)
    bias = bias.astype(dtype)

    # Block-banded expansion of the (tiny, batch-independent) parameters:
    #   wbands[f, g*D + d] = weight[f, d] if g == f else 0
    eye = jnp.eye(F, dtype=dtype)
    wbands = (eye[:, :, None] * weight[None, :, :]).reshape(F, FD)
    bias_eff = bias.reshape(1, FD) + wbands[0:1]      # CLS column is all ones -> fold into bias
    w_rest = wbands[1:]                               # (d_numerical, FD)

    tb = max(1, min(block_b, B))
    grid = (pl.cdiv(B, tb),)

    itemsize = jnp.dtype(dtype).itemsize
    out_flat = pl.pallas_call(
        _tokenizer_kernel,
        out_shape=jax.ShapeDtypeStruct((B, FD), dtype),
        grid_spec=pltpu.PrefetchScalarGridSpec(
            num_scalar_prefetch=0,
            grid=grid,
            in_specs=[
                pl.BlockSpec((tb, d_numerical), lambda i: (i, 0)),   # batch tile of x_num
                pl.BlockSpec((d_numerical, FD), lambda i: (0, 0)),   # banded weight (shared)
                pl.BlockSpec((1, FD), lambda i: (0, 0)),             # effective bias (shared)
            ],
            out_specs=pl.BlockSpec((tb, FD), lambda i: (i, 0)),      # lane-dense output tile
        ),
        compiler_params=pltpu.CompilerParams(
            dimension_semantics=("parallel",),   # batch tiles split across TensorCores
        ),
        cost_estimate=pl.CostEstimate(
            flops=2 * B * F * D,
            transcendentals=0,
            bytes_accessed=itemsize * (B * d_numerical + (d_numerical + 1) * FD + B * FD),
        ),
    )(x_num, w_rest, bias_eff)

    # Free, contiguous reshape back to the module's (B, F, D) output layout.
    return out_flat.reshape(B, F, D)


def init_params(key: jax.Array, d_numerical: int, d_token: int):
    """Matches nn.init.kaiming_uniform_(weight, a=sqrt(5)) and zeros_(bias)."""
    F = d_numerical + 1
    # kaiming_uniform_ with a=sqrt(5) on a (F, d_token) tensor:
    #   fan_in = d_token, gain = sqrt(2 / (1 + 5)) = sqrt(1/3)
    #   bound  = gain * sqrt(3 / fan_in) = 1 / sqrt(fan_in)
    bound = 1.0 / math.sqrt(d_token)
    weight = jax.random.uniform(
        key, (F, d_token), dtype=jnp.float32, minval=-bound, maxval=bound
    )
    bias = jnp.zeros((F, d_token), dtype=jnp.float32)
    return weight, bias


def reference_forward(x_num, weight, bias):
    B = x_num.shape[0]
    cls = jnp.ones((B, 1), dtype=x_num.dtype)
    x_aug = jnp.concatenate([cls, x_num], axis=1)            # (B, F)
    return weight[None] * x_aug[:, :, None] + bias[None]     # (B, F, D)


if __name__ == "__main__":
    key = jax.random.PRNGKey(0)
    k_w, k_x = jax.random.split(key)

    B = 256             # small, but enough to exercise a multi-step batch-tiled grid
    d_numerical = 7     # -> F = 8 features (CLS + 7 numeric)
    d_token = 32        # -> F * d_token = 256 (lane-dense flat output)

    weight, bias = init_params(k_w, d_numerical, d_token)
    x_num = jax.random.normal(k_x, (B, d_numerical), dtype=jnp.float32)

    out = tokenizer_forward(x_num, weight, bias, block_b=128)   # grid of 2 batch tiles
    out = jax.block_until_ready(out)

    ref = reference_forward(x_num, weight, bias)
    assert out.shape == (B, d_numerical + 1, d_token)
    assert jnp.allclose(out, ref, atol=1e-6, rtol=1e-6)

    print("KERNEL_OK")
</pallas_src>

<mosaic_0001>
module attributes {stable_mosaic.version = 11 : i64} {
  func.func @_tokenizer_kernel(%arg0: i32, %arg1: memref<128x7xf32, #tpu.memory_space<vmem>>, %arg2: memref<7x256xf32, #tpu.memory_space<vmem>>, %arg3: memref<1x256xf32, #tpu.memory_space<vmem>>, %arg4: memref<128x256xf32, #tpu.memory_space<vmem>>) attributes {dimension_semantics = [#tpu.dimension_semantics<parallel>], iteration_bounds = array<i64: 2>, scalar_prefetch = 0 : i64, scratch_operands = 0 : i64, tpu.core_type = #tpu.core_type<tc>, window_params = [{transform_indices = @transform_0, window_bounds = array<i64: 128, 7>}, {pipeline_mode = #tpu.pipeline_mode<synchronous>, transform_indices = @transform_1, window_bounds = array<i64: 7, 256>}, {pipeline_mode = #tpu.pipeline_mode<synchronous>, transform_indices = @transform_2, window_bounds = array<i64: 1, 256>}, {transform_indices = @transform_3, window_bounds = array<i64: 128, 256>}]} {
    %c0 = arith.constant 0 : index
    %c0_0 = arith.constant 0 : index
    %0 = vector.load %arg1[%c0, %c0_0] : memref<128x7xf32, #tpu.memory_space<vmem>>, vector<128x7xf32>
    %c0_1 = arith.constant 0 : index
    %c0_2 = arith.constant 0 : index
    %1 = vector.load %arg3[%c0_1, %c0_2] : memref<1x256xf32, #tpu.memory_space<vmem>>, vector<1x256xf32>
    %2 = vector.shape_cast %1 : vector<1x256xf32> to vector<1x256xf32>
    %3 = vector.broadcast %2 : vector<1x256xf32> to vector<128x256xf32>
    %4 = vector.extract_strided_slice %0 {offsets = [0, 0], sizes = [128, 1], strides = [1, 1]} : vector<128x7xf32> to vector<128x1xf32>
    %c0_3 = arith.constant 0 : index
    %c0_4 = arith.constant 0 : index
    %5 = vector.load %arg2[%c0_3, %c0_4] : memref<7x256xf32, #tpu.memory_space<vmem>>, vector<1x256xf32>
    %6 = vector.broadcast %4 : vector<128x1xf32> to vector<128x256xf32>
    %7 = vector.broadcast %5 : vector<1x256xf32> to vector<128x256xf32>
    %8 = arith.mulf %6, %7 : vector<128x256xf32>
    %9 = arith.addf %3, %8 : vector<128x256xf32>
    %10 = vector.extract_strided_slice %0 {offsets = [0, 1], sizes = [128, 1], strides = [1, 1]} : vector<128x7xf32> to vector<128x1xf32>
    %c1 = arith.constant 1 : index
    %c0_5 = arith.constant 0 : index
    %11 = vector.load %arg2[%c1, %c0_5] : memref<7x256xf32, #tpu.memory_space<vmem>>, vector<1x256xf32>
    %12 = vector.broadcast %10 : vector<128x1xf32> to vector<128x256xf32>
    %13 = vector.broadcast %11 : vector<1x256xf32> to vector<128x256xf32>
    %14 = arith.mulf %12, %13 : vector<128x256xf32>
    %15 = arith.addf %9, %14 : vector<128x256xf32>
    %16 = vector.extract_strided_slice %0 {offsets = [0, 2], sizes = [128, 1], strides = [1, 1]} : vector<128x7xf32> to vector<128x1xf32>
    %c2 = arith.constant 2 : index
    %c0_6 = arith.constant 0 : index
    %17 = vector.load %arg2[%c2, %c0_6] : memref<7x256xf32, #tpu.memory_space<vmem>>, vector<1x256xf32>
    %18 = vector.broadcast %16 : vector<128x1xf32> to vector<128x256xf32>
    %19 = vector.broadcast %17 : vector<1x256xf32> to vector<128x256xf32>
    %20 = arith.mulf %18, %19 : vector<128x256xf32>
    %21 = arith.addf %15, %20 : vector<128x256xf32>
    %22 = vector.extract_strided_slice %0 {offsets = [0, 3], sizes = [128, 1], strides = [1, 1]} : vector<128x7xf32> to vector<128x1xf32>
    %c3 = arith.constant 3 : index
    %c0_7 = arith.constant 0 : index
    %23 = vector.load %arg2[%c3, %c0_7] : memref<7x256xf32, #tpu.memory_space<vmem>>, vector<1x256xf32>
    %24 = vector.broadcast %22 : vector<128x1xf32> to vector<128x256xf32>
    %25 = vector.broadcast %23 : vector<1x256xf32> to vector<128x256xf32>
    %26 = arith.mulf %24, %25 : vector<128x256xf32>
    %27 = arith.addf %21, %26 : vector<128x256xf32>
    %28 = vector.extract_strided_slice %0 {offsets = [0, 4], sizes = [128, 1], strides = [1, 1]} : vector<128x7xf32> to vector<128x1xf32>
    %c4 = arith.constant 4 : index
    %c0_8 = arith.constant 0 : index
    %29 = vector.load %arg2[%c4, %c0_8] : memref<7x256xf32, #tpu.memory_space<vmem>>, vector<1x256xf32>
    %30 = vector.broadcast %28 : vector<128x1xf32> to vector<128x256xf32>
    %31 = vector.broadcast %29 : vector<1x256xf32> to vector<128x256xf32>
    %32 = arith.mulf %30, %31 : vector<128x256xf32>
    %33 = arith.addf %27, %32 : vector<128x256xf32>
    %34 = vector.extract_strided_slice %0 {offsets = [0, 5], sizes = [128, 1], strides = [1, 1]} : vector<128x7xf32> to vector<128x1xf32>
    %c5 = arith.constant 5 : index
    %c0_9 = arith.constant 0 : index
    %35 = vector.load %arg2[%c5, %c0_9] : memref<7x256xf32, #tpu.memory_space<vmem>>, vector<1x256xf32>
    %36 = vector.broadcast %34 : vector<128x1xf32> to vector<128x256xf32>
    %37 = vector.broadcast %35 : vector<1x256xf32> to vector<128x256xf32>
    %38 = arith.mulf %36, %37 : vector<128x256xf32>
    %39 = arith.addf %33, %38 : vector<128x256xf32>
    %40 = vector.extract_strided_slice %0 {offsets = [0, 6], sizes = [128, 1], strides = [1, 1]} : vector<128x7xf32> to vector<128x1xf32>
    %c6 = arith.constant 6 : index
    %c0_10 = arith.constant 0 : index
    %41 = vector.load %arg2[%c6, %c0_10] : memref<7x256xf32, #tpu.memory_space<vmem>>, vector<1x256xf32>
    %42 = vector.broadcast %40 : vector<128x1xf32> to vector<128x256xf32>
    %43 = vector.broadcast %41 : vector<1x256xf32> to vector<128x256xf32>
    %44 = arith.mulf %42, %43 : vector<128x256xf32>
    %45 = arith.addf %39, %44 : vector<128x256xf32>
    %c0_11 = arith.constant 0 : index
    %c0_12 = arith.constant 0 : index
    %46 = vector.load %arg4[%c0_11, %c0_12] : memref<128x256xf32, #tpu.memory_space<vmem>>, vector<128x256xf32>
    tpu.vector_store %arg4[%c0_11, %c0_12], %45 {strides = array<i32>} : memref<128x256xf32, #tpu.memory_space<vmem>>, vector<128x256xf32>,
    return
  }
  func.func @transform_0(%arg0: i32) -> (i32, i32) {
    %c0_i32 = arith.constant 0 : i32
    %c0_i32_0 = arith.constant 0 : i32
    return %arg0, %c0_i32 : i32, i32
  }
  func.func @transform_1(%arg0: i32) -> (i32, i32) {
    %c0_i32 = arith.constant 0 : i32
    %c0_i32_0 = arith.constant 0 : i32
    %c0_i32_1 = arith.constant 0 : i32
    return %c0_i32, %c0_i32_0 : i32, i32
  }
  func.func @transform_2(%arg0: i32) -> (i32, i32) {
    %c0_i32 = arith.constant 0 : i32
    %c0_i32_0 = arith.constant 0 : i32
    %c0_i32_1 = arith.constant 0 : i32
    return %c0_i32, %c0_i32_0 : i32, i32
  }
  func.func @transform_3(%arg0: i32) -> (i32, i32) {
    %c0_i32 = arith.constant 0 : i32
    %c0_i32_0 = arith.constant 0 : i32
    return %arg0, %c0_i32 : i32, i32
  }
}

</mosaic_0001>

<bundles_post_ra>
// kernel: tpu_custom_call.1
= control target key start
LH: loop header
LB: loop body
LE: loop exit
PB: predicated region body
PF: predicated region fallthrough
CT: control target
= control target key end

     0   :  { %8 = vsyncpa [#allocation3], 0  ;;  %s2539_s0 = inlined_call_operand.vmem [shape: f32[256,7], index: 0, kind: input, shape index: {}]   ;;  %s2540_s1 = inlined_call_operand.vmem [shape: f32[7,256], index: 1, kind: input, shape index: {}]   ;;  %s2541_s2 = inlined_call_operand.vmem [shape: f32[1,256], index: 2, kind: input, shape index: {}]   ;;  %s2542_s3 = inlined_call_operand.hbm [shape: f32[256,256], index: 3, kind: output, shape index: {}]  }
   0x1   :  { %10 = vsyncpa [#allocation3 + $0x1], 0  ;;  %s1488_s12 = smov 0   ;;  %s1490_s13 = smov 0  }
   0x2   :  { %s1492_s14 = smov 0   ;;  %s1494_s15 = smov 0  }
   0x3 LB: > { %s1509_s16 = sadd.s32 4294967295, %s1456_s15   ;;  %s1311_s17 = sadd.s32 4294967294, %s1456_s15   ;;  %s1456_s15 = sphi %s1494_s15, %s2615_s15   ;;  %s1452_s14 = sphi %s1492_s14, %s2614_s14   ;;  %s1448_s13 = sphi %s1490_s13, %s2613_s13   ;;  %s1444_s12 = sphi %s1488_s12, %s2612_s12  }
   0x4   : > { %s1513_s18 = sadd.s32 1, %s1456_s15   ;;  %s91_s19 = sadd.s32 1, %s1452_s14 }
   0x5   : > { %s88_s20 = ssub.s32 %s1456_s15, %s1513_s18  ;;  %p101_p0 = scmp.ne.s32.totalorder %s1452_s14, %s1448_s13 }
   0x6   : > { %p89_p1 = scmp.eq.s32.totalorder %s88_s20, 0  ;;  %p102_p2 = scmp.eq.s32.totalorder %s1509_s16, 1 }
   0x7   : > { %p107_p3 = scmp.ne.s32.totalorder %s1448_s13, %s1444_s12  ;;  %p108_p4 = scmp.eq.s32.totalorder %s1311_s17, 1 }
   0x8   : > { %s1524_s21 = scalar_select %p89_p1, %s1452_s14, %s91_s19  }
   0x9   : > { %p1526_p5 = por %p102_p2, %p101_p0  ;;  %p1530_p6 = por %p108_p4, %p107_p3 }
   0xa   : > { %p1314_p7 = scmp.ge.s32.totalorder %s1456_s15, 1  ;;  %p141_p8 = scmp.lt.s32.totalorder %s1456_s15, 3 }
   0xc   : > { %p142_p9 = pnand %p1314_p7, %p141_p8 }
   0xe   : > { %145 = sbr.rel (%p142_p9) target bundleno = 413 (0x19d), region = 32 }
  0x15   : > { %s1316_s24 = sshll.u32 %s1509_s16, 4  ;;  %v1458_v0 = vmov 0   ;;  %v1459_v17 = vmov 1   ;;  %v1460_v18 = vmov 2   ;;  %v1461_v19 = vmov 3   ;;  %s162_s27 = sand.u32 1, %s1448_s13  }
  0x16   : > { %1381 = vset.pattern.permute.xlu1 %v1458_v0  ;;  %1380 = vset.pattern.permute.xlu0 %v1458_v0  ;;  %p166_p10 = scmp.lt.s32.totalorder %s1316_s24, 31  ;;  %v1462_v21 = vmov 4   ;;  %v1463_v37 = vmov 5   ;;  %v190_v38 = vlaneseq  ;;  %v200_v46 = vld [vmem:[%s2540_s1] ss:$8 sm:$0x3] }
  0x17   : > { %v188_v51 = vld [vmem:[%s2541_s2] sm:$0x3]  ;;  %s1331_s30 = sshll.u32 %s1509_s16, 12  ;;  %s2498_s16 = scalar_lea.sflag [#allocation3], %s162_s27 }
  0x18   : > { %s2617_s24 = smov (!%p166_p10, %s1316_s24), 31  ;;  %v191_v41 = vshrl.u32 %v190_v38, 7  ;;  %v1318_v52 = vld [vmem:[%s2540_s1 + $0x1] ss:$8 sm:$0x3]  ;;  %s2490_s7 = scalar_lea.hbm %s2542_s3, %s1331_s30 }
  0x19   : > { %s1317_s25 = sshll.u32 %s2617_s24, 3  ;;  %s1465_s9 = smov [#allocation2]  }
  0x1a   : > { %s169_s28 = scalar_lea.vmem %s2539_s0, %s1317_s25  ;;  %v1686_v44 = vsub.s32 0, %v191_v41  ;;  %v1688_v45 = vsub.s32 1, %v191_v41  ;;  %s1398_s10 = sshll.u32 %s1465_s9, 4  ;;  %s1399_s10 = int_to_ptr.vmem [resolvable:$false] %s1398_s10 }
  0x1b   : > { %v1540_v1 = vld [vmem:[%s169_s28 + $0x10] sm:$0xff]  ;;  %v1542_v2 = vld [vmem:[%s169_s28] sm:$0xff]  ;;  %v1546_v3 = vld [vmem:[%s169_s28 + $0x18] sm:$0xff]  ;;  %s1400_s11 = scalar_lea.vmem %s1399_s10, 8192 }
  0x1c   : > { %213 = vperm.xlu1 %1381, %v1540_v1   ;;  %203 = vperm.xlu0 %1380, %v1542_v2   ;;  %v1548_v4 = vld [vmem:[%s169_s28 + $0x8] sm:$0xff]  ;;  %v1554_v6 = vld [vmem:[%s169_s28 + $0x20] sm:$0xff]  ;;  %v1558_v7 = vld [vmem:[%s169_s28 + $0x38] sm:$0xff]  ;;  %2570 = vst [vmem:[#allocation12_spill] sm:$0xff] %v1686_v44  ;;  %v1700_v49 = vrot.slane %v200_v46, %v1686_v44  ;;  %v1703_v50 = vrot.slane %v200_v46, %v1688_v45 }
  0x1d   : > { %v1552_v5 = vld [vmem:[%s169_s28 + $0x28] sm:$0xff]  ;;  %2563 = vst [vmem:[#allocation5_spill] sm:$0xff] %v1558_v7  ;;  %v1560_v8 = vld [vmem:[%s169_s28 + $0x30] sm:$0xff]  ;;  %v1566_v10 = vld [vmem:[%s169_s28 + $0x40] sm:$0xff]  ;;  %v1720_v57 = vrot.slane %v188_v51, %v1686_v44  ;;  %v1723_v58 = vrot.slane %v188_v51, %v1688_v45  ;;  %v1726_v59 = vrot.slane %v1318_v52, %v1686_v44  ;;  %v1729_v60 = vrot.slane %v1318_v52, %v1688_v45 }
  0x1e   : > { %v1564_v9 = vld [vmem:[%s169_s28 + $0x48] sm:$0xff]  ;;  %v1570_v11 = vld [vmem:[%s169_s28 + $0x58] sm:$0xff]  ;;  %v1572_v12 = vld [vmem:[%s169_s28 + $0x50] sm:$0xff]  ;;  %2571 = vst [vmem:[#allocation13_spill] sm:$0xff] %v1688_v45 }
  0x1f   : > { %2564 = vst [vmem:[#allocation6_spill] sm:$0xff] %v1564_v9  ;;  %2565 = vst [vmem:[#allocation7_spill] sm:$0xff] %v1570_v11  ;;  %v1576_v13 = vld [vmem:[%s169_s28 + $0x68] sm:$0xff]  ;;  %v1578_v14 = vld [vmem:[%s169_s28 + $0x60] sm:$0xff] }
  0x20   : > { %218 = vperm.xlu1 %1381, %v1546_v3   ;;  %208 = vperm.xlu0 %1380, %v1548_v4   ;;  %2566 = vst [vmem:[#allocation8_spill] sm:$0xff] %v1576_v13  ;;  %v1582_v15 = vld [vmem:[%s169_s28 + $0x78] sm:$0xff]  ;;  %v1584_v16 = vld [vmem:[%s169_s28 + $0x70] sm:$0xff]  ;;  %s1315_s28 = sshll.u32 %s162_s27, 8 }
  0x21   : > { %2567 = vst [vmem:[#allocation9_spill] sm:$0xff] %v1582_v15  ;;  %s2335_s29 = scalar_lea.vmem [#allocation2], %s1315_s28 }
  0x22   : > { %s1249_s4 = sshll.u32 %s2335_s29, 4  ;;  %s2492_s4 = int_to_ptr.vmem [resolvable:$true] %s1249_s4 }
  0x23   : > { %s1394_s8 = scalar_lea.vmem %s2492_s4, 4096  ;;  %p1401_p0 = scmp.lt.s32.totalorder %s2492_s4, %s1399_s10 }
  0x24   : > { %228 = vperm.xlu1 %1381, %v1552_v5   ;;  %223 = vperm.xlu0 %1380, %v1554_v6   ;;  %p1395_p11 = scmp.ne.s32.totalorder %s2492_s4, %s1394_s8  ;;  %p1402_p1 = scmp.lt.s32.totalorder %s1400_s11, %s1394_s8 }
  0x26   : > { %p1396_p12 = pnand %p1395_p11, %p1526_p5  ;;  %p1403_p2 = por %p1402_p1, %p1401_p0 }
  0x28   : > { %238 = vperm.xlu1 %1381, %v1558_v7   ;;  %233 = vperm.xlu0 %1380, %v1560_v8   ;;  %p1397_p13 = pneg %p1396_p12 }
  0x2a   : > { %p1404_p3 = pnand %p1403_p2, %p1397_p13 }
  0x2c   : > { %248 = vperm.xlu1 %1381, %v1564_v9   ;;  %243 = vperm.xlu0 %1380, %v1566_v10  }
  0x30   : > { %258 = vperm.xlu1 %1381, %v1570_v11   ;;  %253 = vperm.xlu0 %1380, %v1572_v12  }
  0x34   : > { %268 = vperm.xlu1 %1381, %v1576_v13   ;;  %263 = vperm.xlu0 %1380, %v1578_v14  }
  0x38   : > { %278 = vperm.xlu1 %1381, %v1582_v15   ;;  %273 = vperm.xlu0 %1380, %v1584_v16  }
  0x3c   : > { %1383 = vset.pattern.permute.xlu1 %v1459_v17  ;;  %1382 = vset.pattern.permute.xlu0 %v1459_v17 }
  0x3d   : > { %363 = vperm.xlu1 %1383, %v1548_v4   ;;  %359 = vperm.xlu0 %1382, %v1542_v2  }
  0x41   : > { %367 = vperm.xlu1 %1383, %v1540_v1   ;;  %371 = vperm.xlu0 %1382, %v1546_v3  }
  0x45   : > { %375 = vperm.xlu1 %1383, %v1554_v6   ;;  %379 = vperm.xlu0 %1382, %v1552_v5  }
  0x49   : > { %383 = vperm.xlu1 %1383, %v1560_v8   ;;  %387 = vperm.xlu0 %1382, %v1558_v7  }
  0x4d   : > { %391 = vperm.xlu1 %1383, %v1566_v10   ;;  %395 = vperm.xlu0 %1382, %v1564_v9  }
  0x51   : > { %399 = vperm.xlu1 %1383, %v1572_v12   ;;  %403 = vperm.xlu0 %1382, %v1570_v11  }
  0x55   : > { %407 = vperm.xlu1 %1383, %v1578_v14   ;;  %411 = vperm.xlu0 %1382, %v1576_v13  }
  0x59   : > { %415 = vperm.xlu1 %1383, %v1584_v16   ;;  %419 = vperm.xlu0 %1382, %v1582_v15  }
  0x5d   : > { %1384 = vset.pattern.permute.xlu1 %v1460_v18  ;;  %1385 = vset.pattern.permute.xlu0 %v1460_v18 }
  0x5e   : > { %500 = vperm.xlu1 %1384, %v1542_v2   ;;  %504 = vperm.xlu0 %1385, %v1548_v4  }
  0x62   : > { %508 = vperm.xlu1 %1384, %v1540_v1   ;;  %516 = vperm.xlu0 %1385, %v1554_v6  }
  0x66   : > { %512 = vperm.xlu1 %1384, %v1546_v3   ;;  %524 = vperm.xlu0 %1385, %v1560_v8  }
  0x6a   : > { %520 = vperm.xlu1 %1384, %v1552_v5   ;;  %532 = vperm.xlu0 %1385, %v1566_v10  }
  0x6e   : > { %528 = vperm.xlu1 %1384, %v1558_v7   ;;  %540 = vperm.xlu0 %1385, %v1572_v12  }
  0x72   : > { %536 = vperm.xlu1 %1384, %v1564_v9   ;;  %548 = vperm.xlu0 %1385, %v1578_v14  }
  0x76   : > { %544 = vperm.xlu1 %1384, %v1570_v11   ;;  %556 = vperm.xlu0 %1385, %v1584_v16  }
  0x7a   : > { %552 = vperm.xlu1 %1384, %v1576_v13   ;;  %1386 = vset.pattern.permute.xlu0 %v1461_v19 }
  0x7b   : > { %641 = vperm.xlu0 %1386, %v1542_v2  }
  0x7e   : > { %560 = vperm.xlu1 %1384, %v1582_v15  }
  0x7f   : > { %653 = vperm.xlu0 %1386, %v1546_v3  }
  0x82   : > { %1387 = vset.pattern.permute.xlu1 %v1461_v19 }
  0x83   : > { %645 = vperm.xlu1 %1387, %v1548_v4   ;;  %661 = vperm.xlu0 %1386, %v1552_v5  }
  0x87   : > { %649 = vperm.xlu1 %1387, %v1540_v1   ;;  %669 = vperm.xlu0 %1386, %v1558_v7  }
  0x8b   : > { %657 = vperm.xlu1 %1387, %v1554_v6   ;;  %677 = vperm.xlu0 %1386, %v1564_v9  }
  0x8f   : > { %665 = vperm.xlu1 %1387, %v1560_v8   ;;  %685 = vperm.xlu0 %1386, %v1570_v11  }
  0x93   : > { %673 = vperm.xlu1 %1387, %v1566_v10   ;;  %693 = vperm.xlu0 %1386, %v1576_v13  }
  0x97   : > { %681 = vperm.xlu1 %1387, %v1572_v12   ;;  %701 = vperm.xlu0 %1386, %v1582_v15  }
  0x9b   : > { %v1634_v20 = vpop.permute.xlu1 %213  ;;  %689 = vperm.xlu1 %1387, %v1578_v14   ;;  %1389 = vset.pattern.permute.xlu0 %v1462_v21  ;;  %v1637_v22 = vpop.permute.xlu0 %203 }
  0x9c   : > { %786 = vperm.xlu0 %1389, %v1548_v4  }
  0x9f   : > { %v1640_v23 = vpop.permute.xlu1 %218  ;;  %697 = vperm.xlu1 %1387, %v1584_v16   ;;  %v1643_v24 = vpop.permute.xlu0 %208 }
  0xa0   : > { %798 = vperm.xlu0 %1389, %v1554_v6  }
  0xa3   : > { %v1646_v25 = vpop.permute.xlu1 %228  ;;  %1388 = vset.pattern.permute.xlu1 %v1462_v21  ;;  %v1648_v26 = vpop.permute.xlu0 %223 }
  0xa4   : > { %782 = vperm.xlu1 %1388, %v1542_v2   ;;  %806 = vperm.xlu0 %1389, %v1560_v8  }
  0xa7   : > { %v1652_v27 = vpop.permute.xlu1 %238  ;;  %v1654_v28 = vpop.permute.xlu0 %233 }
  0xa8   : > { %790 = vperm.xlu1 %1388, %v1540_v1   ;;  %814 = vperm.xlu0 %1389, %v1566_v10  }
  0xab   : > { %v1658_v29 = vpop.permute.xlu1 %248  ;;  %v244_v30 = vpop.permute.xlu0 %243 }
  0xac   : > { %794 = vperm.xlu1 %1388, %v1546_v3   ;;  %822 = vperm.xlu0 %1389, %v1572_v12   ;;  %v308_v55 = vmul.f32 %v1700_v49, %v244_v30  ;;  %v309_v56 = vmul.f32 %v1703_v50, %v244_v30 }
  0xae   : > { %v340_v17 = vadd.f32 %v308_v55, %v1720_v57  ;;  %v341_v18 = vadd.f32 %v309_v56, %v1723_v58 }
  0xaf   : > { %v1662_v31 = vpop.permute.xlu1 %258  ;;  %v254_v32 = vpop.permute.xlu0 %253 }
  0xb0   : > { %802 = vperm.xlu1 %1388, %v1552_v5   ;;  %830 = vperm.xlu0 %1389, %v1578_v14   ;;  %v312_v61 = vmul.f32 %v1700_v49, %v254_v32  ;;  %v313_v62 = vmul.f32 %v1703_v50, %v254_v32 }
  0xb2   : > { %v344_v32 = vadd.f32 %v312_v61, %v1720_v57  ;;  %v345_v38 = vadd.f32 %v313_v62, %v1723_v58 }
  0xb3   : > { %v1666_v33 = vpop.permute.xlu1 %268  ;;  %v264_v34 = vpop.permute.xlu0 %263 }
  0xb4   : > { %810 = vperm.xlu1 %1388, %v1558_v7   ;;  %838 = vperm.xlu0 %1389, %v1584_v16   ;;  %v316_v51 = vmul.f32 %v1700_v49, %v264_v34  ;;  %v317_v52 = vmul.f32 %v1703_v50, %v264_v34 }
  0xb6   : > { %v348_v34 = vadd.f32 %v316_v51, %v1720_v57  ;;  %v1319_v51 = vld [vmem:[%s2540_s1 + $0x2] ss:$8 sm:$0x3] }
  0xb7   : > { %v1670_v35 = vpop.permute.xlu1 %278  ;;  %v274_v36 = vpop.permute.xlu0 %273 }
  0xb8   : > { %818 = vperm.xlu1 %1388, %v1564_v9   ;;  %1390 = vset.pattern.permute.xlu0 %v1463_v37  ;;  %v320_v62 = vmul.f32 %v1700_v49, %v274_v36 }
  0xb9   : > { %923 = vperm.xlu0 %1390, %v1542_v2  }
  0xbc   : > { %v1674_v39 = vpop.permute.xlu1 %363  ;;  %826 = vperm.xlu1 %1388, %v1570_v11   ;;  %v1677_v40 = vpop.permute.xlu0 %359 }
  0xbd   : > { %2568 = vst [vmem:[#allocation10_spill] sm:$0xff] %v1674_v39  ;;  %935 = vperm.xlu0 %1390, %v1546_v3   ;;  %v301_v39 = vmul.f32 %v1703_v50, %v1648_v26 }
  0xc0   : > { %v1680_v42 = vpop.permute.xlu1 %367  ;;  %834 = vperm.xlu1 %1388, %v1576_v13   ;;  %v1683_v43 = vpop.permute.xlu0 %371 }
  0xc1   : > { %2569 = vst [vmem:[#allocation11_spill] sm:$0xff] %v1680_v42  ;;  %943 = vperm.xlu0 %1390, %v1552_v5   ;;  %v2550_v42 = vmov 6  }
  0xc4   : > { %v1693_v47 = vpop.permute.xlu1 %375  ;;  %842 = vperm.xlu1 %1388, %v1582_v15   ;;  %v1696_v48 = vpop.permute.xlu0 %379 }
  0xc5   : > { %951 = vperm.xlu0 %1390, %v1558_v7  }
  0xc8   : > { %v1711_v53 = vpop.permute.xlu1 %383  ;;  %1391 = vset.pattern.permute.xlu1 %v1463_v37  ;;  %v1713_v54 = vpop.permute.xlu0 %387 }
  0xc9   : > { %927 = vperm.xlu1 %1391, %v1548_v4   ;;  %959 = vperm.xlu0 %1390, %v1564_v9   ;;  %v1802_v9 = vrot.slane %v1319_v51, %v1686_v44 }
  0xcc   : > { %v392_v63 = vpop.permute.xlu1 %391  ;;  %v1733_v0 = vpop.permute.xlu0 %395 }
  0xcd   : > { %v449_v19 = vmul.f32 %v1726_v59, %v392_v63  ;;  %v450_v21 = vmul.f32 %v1729_v60, %v392_v63  ;;  %931 = vperm.xlu1 %1391, %v1540_v1   ;;  %967 = vperm.xlu0 %1390, %v1570_v11  }
  0xcf   : > { %v1741_v30 = vadd.f32 %v449_v19, %v340_v17  ;;  %v1743_v37 = vadd.f32 %v450_v21, %v341_v18  ;;  %v321_v17 = vmul.f32 %v1703_v50, %v274_v36  ;;  %v349_v21 = vadd.f32 %v317_v52, %v1723_v58 }
  0xd0   : > { %v400_v41 = vpop.permute.xlu1 %399  ;;  %v1747_v46 = vpop.permute.xlu0 %403  ;;  %v298_v52 = vmul.f32 %v1700_v49, %v1640_v23 }
  0xd1   : > { %v453_v55 = vmul.f32 %v1726_v59, %v400_v41  ;;  %v454_v56 = vmul.f32 %v1729_v60, %v400_v41  ;;  %939 = vperm.xlu1 %1391, %v1554_v6   ;;  %975 = vperm.xlu0 %1390, %v1576_v13  }
  0xd3   : > { %v1755_v63 = vadd.f32 %v453_v55, %v344_v32  ;;  %v1757_v61 = vadd.f32 %v454_v56, %v345_v38  ;;  %v292_v32 = vmul.f32 %v1700_v49, %v1637_v22  ;;  %v293_v38 = vmul.f32 %v1703_v50, %v1637_v22 }
  0xd4   : > { %v408_v18 = vpop.permute.xlu1 %407  ;;  %v1761_v19 = vpop.permute.xlu0 %411  ;;  %v299_v56 = vmul.f32 %v1703_v50, %v1640_v23  ;;  %v353_v22 = vadd.f32 %v321_v17, %v1723_v58  ;;  %v1320_v23 = vld [vmem:[%s2540_s1 + $0x3] ss:$8 sm:$0x3] }
  0xd5   : > { %v457_v41 = vmul.f32 %v1726_v59, %v408_v18  ;;  %v458_v11 = vmul.f32 %v1729_v60, %v408_v18  ;;  %947 = vperm.xlu1 %1391, %v1560_v8   ;;  %983 = vperm.xlu0 %1390, %v1582_v15   ;;  %v352_v18 = vadd.f32 %v320_v62, %v1720_v57 }
  0xd6   : > { %v324_v62 = vadd.f32 %v292_v32, %v1720_v57  ;;  %v325_v17 = vadd.f32 %v293_v38, %v1723_v58  ;;  %v1818_v38 = vmul.f32 %v1700_v49, %v1634_v20 }
  0xd7   : > { %v1773_v36 = vadd.f32 %v457_v41, %v348_v34  ;;  %v1775_v55 = vadd.f32 %v458_v11, %v349_v21  ;;  %v433_v11 = vmul.f32 %v1726_v59, %v1677_v40  ;;  %v434_v34 = vmul.f32 %v1729_v60, %v1677_v40 }
  0xd8   : > { %v416_v13 = vpop.permute.xlu1 %415  ;;  %v1786_v15 = vpop.permute.xlu0 %419  ;;  %v1805_v40 = vrot.slane %v1319_v51, %v1688_v45  ;;  %2573 = vst [vmem:[#allocation15_spill] sm:$0xff] %v1818_v38  ;;  %v1822_v51 = vmul.f32 %v1703_v50, %v1634_v20  ;;  %v441_v20 = vmul.f32 %v1726_v59, %v1693_v47  ;;  %v307_v38 = vmul.f32 %v1703_v50, %v1652_v27 }
  0xd9   : > { %2572 = vst [vmem:[#allocation14_spill] sm:$0xff] %v1786_v15  ;;  %v461_v21 = vmul.f32 %v1726_v59, %v416_v13  ;;  %v462_v41 = vmul.f32 %v1729_v60, %v416_v13  ;;  %955 = vperm.xlu1 %1391, %v1566_v10   ;;  %1393 = vset.pattern.permute.xlu0 %v2550_v42 }
  0xda   : > { %v300_v13 = vmul.f32 %v1700_v49, %v1648_v26  ;;  %1068 = vperm.xlu0 %1393, %v1548_v4   ;;  %2574 = vst [vmem:[#allocation16_spill] sm:$0xff] %v1822_v51  ;;  %v1825_v42 = vrot.slane %v1320_v23, %v1686_v44  ;;  %v1828_v15 = vrot.slane %v1320_v23, %v1688_v45 }
  0xdb   : > { %v1811_v7 = vadd.f32 %v461_v21, %v352_v18  ;;  %v1813_v32 = vadd.f32 %v462_v41, %v353_v22  ;;  %v330_v26 = vadd.f32 %v298_v52, %v1720_v57  ;;  %v331_v18 = vadd.f32 %v299_v56, %v1723_v58 }
  0xdc   : > { %v465_v22 = vadd.f32 %v433_v11, %v324_v62  ;;  %v466_v4 = vadd.f32 %v434_v34, %v325_v17  ;;  %v442_v44 = vmul.f32 %v1729_v60, %v1693_v47  ;;  %v332_v52 = vadd.f32 %v300_v13, %v1720_v57 }
  0xdd   : > { %963 = vperm.xlu1 %1391, %v1572_v12   ;;  %v501_v21 = vpop.permute.xlu1 %500  ;;  %v1833_v41 = vpop.permute.xlu0 %504  ;;  %v333_v56 = vadd.f32 %v301_v39, %v1723_v58  ;;  %v304_v11 = vmul.f32 %v1700_v49, %v1654_v28  ;;  %v305_v34 = vmul.f32 %v1703_v50, %v1654_v28  ;;  %v439_v62 = vmul.f32 %v1726_v59, %v1683_v43 }
  0xde   : > { %2575 = vst [vmem:[#allocation17_spill] sm:$0xff] %v1833_v41  ;;  %v574_v23 = vmul.f32 %v1802_v9, %v501_v21  ;;  %v575_v45 = vmul.f32 %v1805_v40, %v501_v21  ;;  %1080 = vperm.xlu0 %1393, %v1554_v6   ;;  %v440_v47 = vmul.f32 %v1729_v60, %v1683_v43 }
  0xdf   : > { %v302_v39 = vmul.f32 %v1700_v49, %v1646_v25  ;;  %v303_v13 = vmul.f32 %v1703_v50, %v1646_v25  ;;  %v445_v28 = vmul.f32 %v1726_v59, %v1711_v53  ;;  %v446_v6 = vmul.f32 %v1729_v60, %v1711_v53 }
  0xe0   : > { %v1852_v17 = vadd.f32 %v574_v23, %v465_v22  ;;  %v1854_v21 = vadd.f32 %v575_v45, %v466_v4  ;;  %v473_v22 = vadd.f32 %v441_v20, %v332_v52  ;;  %v474_v45 = vadd.f32 %v442_v44, %v333_v56 }
  0xe1   : > { %971 = vperm.xlu1 %1391, %v1578_v14   ;;  %v1865_v51 = vpop.permute.xlu1 %508  ;;  %v517_v43 = vpop.permute.xlu0 %516  ;;  %v306_v25 = vmul.f32 %v1700_v49, %v1652_v27  ;;  %v336_v41 = vadd.f32 %v304_v11, %v1720_v57  ;;  %v337_v53 = vadd.f32 %v305_v34, %v1723_v58  ;;  %v443_v52 = vmul.f32 %v1726_v59, %v1696_v48 }
  0xe2   : > { %2576 = vst [vmem:[#allocation18_spill] sm:$0xff] %v1854_v21  ;;  %2577 = vst [vmem:[#allocation19_spill] sm:$0xff] %v1865_v51  ;;  %v582_v4 = vmul.f32 %v1802_v9, %v517_v43  ;;  %v583_v23 = vmul.f32 %v1805_v40, %v517_v43  ;;  %1088 = vperm.xlu0 %1393, %v1560_v8   ;;  %v471_v51 = vadd.f32 %v439_v62, %v330_v26 }
  0xe3   : > { %v472_v21 = vadd.f32 %v440_v47, %v331_v18  ;;  %v444_v56 = vmul.f32 %v1729_v60, %v1696_v48  ;;  %v477_v43 = vadd.f32 %v445_v28, %v336_v41  ;;  %v478_v27 = vadd.f32 %v446_v6, %v337_v53 }
  0xe4   : > { %v1876_v20 = vadd.f32 %v582_v4, %v473_v22  ;;  %v1878_v44 = vadd.f32 %v583_v23, %v474_v45  ;;  %v334_v47 = vadd.f32 %v302_v39, %v1720_v57  ;;  %v335_v22 = vadd.f32 %v303_v13, %v1723_v58 }
  0xe5   : > { %979 = vperm.xlu1 %1391, %v1584_v16   ;;  %v513_v11 = vpop.permute.xlu1 %512  ;;  %v525_v34 = vpop.permute.xlu0 %524  ;;  %v338_v48 = vadd.f32 %v306_v25, %v1720_v57  ;;  %v339_v41 = vadd.f32 %v307_v38, %v1723_v58  ;;  %v447_v39 = vmul.f32 %v1726_v59, %v1713_v54  ;;  %v448_v13 = vmul.f32 %v1729_v60, %v1713_v54 }
  0xe6   : > { %v580_v8 = vmul.f32 %v1802_v9, %v513_v11  ;;  %v581_v26 = vmul.f32 %v1805_v40, %v513_v11  ;;  %v586_v18 = vmul.f32 %v1802_v9, %v525_v34  ;;  %v587_v62 = vmul.f32 %v1805_v40, %v525_v34  ;;  %1096 = vperm.xlu0 %1393, %v1566_v10  }
  0xe7   : > { %v475_v23 = vadd.f32 %v443_v52, %v334_v47  ;;  %v476_v53 = vadd.f32 %v444_v56, %v335_v22  ;;  %v2578_v25 = vmov 6   ;;  %v310_v52 = vmul.f32 %v1700_v49, %v1658_v29 }
  0xe8   : > { %v1894_v28 = vadd.f32 %v580_v8, %v471_v51  ;;  %v1896_v6 = vadd.f32 %v581_v26, %v472_v21  ;;  %v1898_v45 = vadd.f32 %v586_v18, %v477_v43  ;;  %v1900_v4 = vadd.f32 %v587_v62, %v478_v27 }
  0xe9   : > { %1392 = vset.pattern.permute.xlu1 %v2578_v25  ;;  %v521_v38 = vpop.permute.xlu1 %520  ;;  %v533_v10 = vpop.permute.xlu0 %532  ;;  %v311_v54 = vmul.f32 %v1703_v50, %v1658_v29  ;;  %v314_v56 = vmul.f32 %v1700_v49, %v1662_v31  ;;  %v315_v11 = vmul.f32 %v1703_v50, %v1662_v31  ;;  %v479_v18 = vadd.f32 %v447_v39, %v338_v48 }
  0xea   : > { %v584_v51 = vmul.f32 %v1802_v9, %v521_v38  ;;  %v585_v21 = vmul.f32 %v1805_v40, %v521_v38  ;;  %v590_v43 = vmul.f32 %v1802_v9, %v533_v10  ;;  %v591_v27 = vmul.f32 %v1805_v40, %v533_v10  ;;  %1064 = vperm.xlu1 %1392, %v1542_v2  }
  0xeb   : > { %1104 = vperm.xlu0 %1393, %v1572_v12   ;;  %v480_v29 = vadd.f32 %v448_v13, %v339_v41  ;;  %v451_v62 = vmul.f32 %v1726_v59, %v1733_v0  ;;  %v452_v31 = vmul.f32 %v1729_v60, %v1733_v0  ;;  %v343_v48 = vadd.f32 %v311_v54, %v1723_v58 }
  0xec   : > { %v1921_v34 = vadd.f32 %v584_v51, %v475_v23  ;;  %v1923_v8 = vadd.f32 %v585_v21, %v476_v53  ;;  %v1926_v2 = vadd.f32 %v590_v43, %v1741_v30  ;;  %v1929_v26 = vadd.f32 %v591_v27, %v1743_v37 }
  0xed   : > { %v529_v47 = vpop.permute.xlu1 %528  ;;  %v541_v12 = vpop.permute.xlu0 %540  ;;  %v342_v37 = vadd.f32 %v310_v52, %v1720_v57  ;;  %v346_v41 = vadd.f32 %v314_v56, %v1720_v57  ;;  %v347_v0 = vadd.f32 %v315_v11, %v1723_v58  ;;  %v484_v10 = vadd.f32 %v452_v31, %v343_v48 }
  0xee   : > { %v588_v22 = vmul.f32 %v1802_v9, %v529_v47  ;;  %v589_v23 = vmul.f32 %v1805_v40, %v529_v47  ;;  %v594_v30 = vmul.f32 %v1802_v9, %v541_v12  ;;  %v595_v53 = vmul.f32 %v1805_v40, %v541_v12  ;;  %1072 = vperm.xlu1 %1392, %v1540_v1  }
  0xef   : > { %1112 = vperm.xlu0 %1393, %v1578_v14   ;;  %v483_v1 = vadd.f32 %v451_v62, %v342_v37  ;;  %v455_v51 = vmul.f32 %v1726_v59, %v1747_v46  ;;  %v456_v21 = vmul.f32 %v1729_v60, %v1747_v46  ;;  %v319_v56 = vmul.f32 %v1703_v50, %v1666_v33 }
  0xf0   : > { %v1945_v39 = vadd.f32 %v588_v22, %v479_v18  ;;  %v1947_v13 = vadd.f32 %v589_v23, %v480_v29  ;;  %v1950_v25 = vadd.f32 %v594_v30, %v1755_v63  ;;  %v1953_v38 = vadd.f32 %v595_v53, %v1757_v61 }
  0xf1   : > { %v537_v43 = vpop.permute.xlu1 %536  ;;  %v549_v14 = vpop.permute.xlu0 %548  ;;  %v318_v61 = vmul.f32 %v1700_v49, %v1666_v33  ;;  %v322_v46 = vmul.f32 %v1700_v49, %v1670_v35  ;;  %v323_v11 = vmul.f32 %v1703_v50, %v1670_v35  ;;  %v487_v31 = vadd.f32 %v455_v51, %v346_v41 }
  0xf2   : > { %v592_v27 = vmul.f32 %v1802_v9, %v537_v43  ;;  %v593_v52 = vmul.f32 %v1805_v40, %v537_v43  ;;  %v598_v63 = vmul.f32 %v1802_v9, %v549_v14  ;;  %v599_v54 = vmul.f32 %v1805_v40, %v549_v14  ;;  %1076 = vperm.xlu1 %1392, %v1546_v3  }
  0xf3   : > { %1120 = vperm.xlu0 %1393, %v1584_v16   ;;  %v488_v33 = vadd.f32 %v456_v21, %v347_v0  ;;  %v459_v47 = vmul.f32 %v1726_v59, %v1761_v19  ;;  %v460_v35 = vmul.f32 %v1729_v60, %v1761_v19  ;;  %v295_v53 = vmul.f32 %v1703_v50, %v1643_v24 }
  0xf4   : > { %v1973_v18 = vadd.f32 %v592_v27, %v483_v1  ;;  %v1975_v29 = vadd.f32 %v593_v52, %v484_v10  ;;  %v1978_v3 = vadd.f32 %v598_v63, %v1773_v36  ;;  %v1981_v62 = vadd.f32 %v599_v54, %v1775_v55  ;;  %v2579_v10 = vld [vmem:[#allocation14_spill] sm:$0xff]  ;;  %v2580_v27 = vld [vmem:[#allocation5_spill] sm:$0xff] }
  0xf5   : > { %v545_v12 = vpop.permute.xlu1 %544  ;;  %v557_v16 = vpop.permute.xlu0 %556  ;;  %v294_v55 = vmul.f32 %v1700_v49, %v1643_v24  ;;  %v350_v19 = vadd.f32 %v318_v61, %v1720_v57  ;;  %v351_v37 = vadd.f32 %v319_v56, %v1723_v58  ;;  %v355_v49 = vadd.f32 %v323_v11, %v1723_v58  ;;  %v2581_v52 = vld [vmem:[#allocation10_spill] sm:$0xff] }
  0xf6   : > { %v596_v22 = vmul.f32 %v1802_v9, %v545_v12  ;;  %v597_v23 = vmul.f32 %v1805_v40, %v545_v12  ;;  %v602_v36 = vmul.f32 %v1802_v9, %v557_v16  ;;  %v603_v30 = vmul.f32 %v1805_v40, %v557_v16  ;;  %1084 = vperm.xlu1 %1392, %v1552_v5   ;;  %v2582_v16 = vld [vmem:[#allocation18_spill] sm:$0xff] }
  0xf7   : > { %v354_v5 = vadd.f32 %v322_v46, %v1720_v57  ;;  %v463_v24 = vmul.f32 %v1726_v59, %v2579_v10  ;;  %v464_v50 = vmul.f32 %v1729_v60, %v2579_v10  ;;  %v491_v21 = vadd.f32 %v459_v47, %v350_v19 }
  0xf8   : > { %v1998_v48 = vadd.f32 %v596_v22, %v487_v31  ;;  %v2000_v41 = vadd.f32 %v597_v23, %v488_v33  ;;  %v2003_v0 = vadd.f32 %v602_v36, %v1811_v7  ;;  %v2006_v1 = vadd.f32 %v603_v30, %v1813_v32  ;;  %v2583_v36 = vld [vmem:[#allocation17_spill] sm:$0xff] }
  0xf9   : > { %v553_v51 = vpop.permute.xlu1 %552  ;;  %v492_v43 = vadd.f32 %v460_v35, %v351_v37  ;;  %v435_v63 = vmul.f32 %v1726_v59, %v2581_v52  ;;  %v436_v54 = vmul.f32 %v1729_v60, %v2581_v52  ;;  %v326_v46 = vadd.f32 %v294_v55, %v1720_v57  ;;  %v2584_v37 = vld [vmem:[#allocation6_spill] sm:$0xff] }
  0xfa   : > { %v600_v14 = vmul.f32 %v1802_v9, %v553_v51  ;;  %v601_v7 = vmul.f32 %v1805_v40, %v553_v51  ;;  %1092 = vperm.xlu1 %1392, %v2580_v27   ;;  %v642_v32 = vpop.permute.xlu0 %641  ;;  %v327_v11 = vadd.f32 %v295_v53, %v1723_v58  ;;  %v495_v47 = vadd.f32 %v463_v24, %v354_v5 }
  0xfb   : > { %v715_v61 = vmul.f32 %v1825_v42, %v642_v32  ;;  %v716_v56 = vmul.f32 %v1828_v15, %v642_v32  ;;  %v496_v35 = vadd.f32 %v464_v50, %v355_v49  ;;  %v576_v30 = vmul.f32 %v1802_v9, %v2583_v36  ;;  %v2585_v50 = vld [vmem:[#allocation11_spill] sm:$0xff]  ;;  %v2587_v32 = vld [vmem:[#allocation16_spill] sm:$0xff] }
  0xfc   : > { %v2025_v31 = vadd.f32 %v600_v14, %v491_v21  ;;  %v2027_v33 = vadd.f32 %v601_v7, %v492_v43  ;;  %v577_v55 = vmul.f32 %v1805_v40, %v2583_v36  ;;  %v467_v49 = vadd.f32 %v435_v63, %v326_v46  ;;  %v2586_v7 = vld [vmem:[#allocation15_spill] sm:$0xff] }
  0xfd   : > { %v2030_v12 = vadd.f32 %v715_v61, %v1852_v17  ;;  %v2033_v22 = vadd.f32 %v716_v56, %v2582_v16  ;;  %v561_v23 = vpop.permute.xlu1 %560  ;;  %v468_v17 = vadd.f32 %v436_v54, %v327_v11  ;;  %v437_v51 = vmul.f32 %v1726_v59, %v2585_v50  ;;  %v2588_v56 = vld [vmem:[#allocation19_spill] sm:$0xff] }
  0xfe   : > { %v604_v53 = vmul.f32 %v1802_v9, %v561_v23  ;;  %v605_v19 = vmul.f32 %v1805_v40, %v561_v23  ;;  %1100 = vperm.xlu1 %1392, %v2584_v37   ;;  %v654_v5 = vpop.permute.xlu0 %653  ;;  %v438_v21 = vmul.f32 %v1729_v60, %v2585_v50  ;;  %v328_v27 = vadd.f32 %v2586_v7, %v1720_v57  ;;  %v2589_v11 = vld [vmem:[#allocation7_spill] sm:$0xff] }
  0xff   : > { %v721_v10 = vmul.f32 %v1825_v42, %v654_v5  ;;  %v722_v24 = vmul.f32 %v1828_v15, %v654_v5  ;;  %v329_v52 = vadd.f32 %v2587_v32, %v1723_v58  ;;  %v608_v59 = vadd.f32 %v576_v30, %v467_v49 }
 0x100   : > { %v2048_v43 = vadd.f32 %v604_v53, %v495_v47  ;;  %v2050_v14 = vadd.f32 %v605_v19, %v496_v35  ;;  %v609_v61 = vadd.f32 %v577_v55, %v468_v17  ;;  %v578_v60 = vmul.f32 %v1802_v9, %v2588_v56  ;;  %v2590_v19 = vld [vmem:[#allocation8_spill] sm:$0xff] }
 0x101   : > { %v2057_v63 = vadd.f32 %v721_v10, %v1894_v28  ;;  %v2060_v54 = vadd.f32 %v722_v24, %v1896_v6  ;;  %v579_v46 = vmul.f32 %v1805_v40, %v2588_v56  ;;  %v469_v16 = vadd.f32 %v437_v51, %v328_v27 }
 0x102   : > { %1108 = vperm.xlu1 %1392, %v2589_v11   ;;  %v646_v57 = vpop.permute.xlu1 %645  ;;  %v662_v47 = vpop.permute.xlu0 %661  ;;  %v470_v23 = vadd.f32 %v438_v21, %v329_v52  ;;  %v2591_v21 = vld [vmem:[#allocation9_spill] sm:$0xff] }
 0x103   : > { %v717_v58 = vmul.f32 %v1825_v42, %v646_v57  ;;  %v718_v28 = vmul.f32 %v1828_v15, %v646_v57  ;;  %v725_v35 = vmul.f32 %v1825_v42, %v662_v47  ;;  %v726_v6 = vmul.f32 %v1828_v15, %v662_v47 }
 0x104   : > { %v610_v55 = vadd.f32 %v578_v60, %v469_v16  ;;  %v611_v53 = vadd.f32 %v579_v46, %v470_v23 }
 0x105   : > { %v2071_v36 = vadd.f32 %v717_v58, %v608_v59  ;;  %v2073_v9 = vadd.f32 %v718_v28, %v609_v61  ;;  %v2076_v40 = vadd.f32 %v725_v35, %v1921_v34  ;;  %v2079_v30 = vadd.f32 %v726_v6, %v1923_v8 }
 0x106   : > { %1116 = vperm.xlu1 %1392, %v2590_v19   ;;  %v650_v37 = vpop.permute.xlu1 %649  ;;  %v670_v5 = vpop.permute.xlu0 %669 }
 0x107   : > { %v719_v49 = vmul.f32 %v1825_v42, %v650_v37  ;;  %v720_v17 = vmul.f32 %v1828_v15, %v650_v37  ;;  %v729_v10 = vmul.f32 %v1825_v42, %v670_v5  ;;  %v730_v24 = vmul.f32 %v1828_v15, %v670_v5 }
 0x109   : > { %v2086_v50 = vadd.f32 %v719_v49, %v610_v55  ;;  %v2088_v34 = vadd.f32 %v720_v17, %v611_v53  ;;  %v2091_v8 = vadd.f32 %v729_v10, %v1945_v39  ;;  %v2094_v51 = vadd.f32 %v730_v24, %v1947_v13 }
 0x10a   : > { %1124 = vperm.xlu1 %1392, %v2591_v21   ;;  %v658_v7 = vpop.permute.xlu1 %657  ;;  %v678_v27 = vpop.permute.xlu0 %677 }
 0x10b   : > { %v723_v32 = vmul.f32 %v1825_v42, %v658_v7  ;;  %v724_v52 = vmul.f32 %v1828_v15, %v658_v7  ;;  %v733_v59 = vmul.f32 %v1825_v42, %v678_v27  ;;  %v734_v61 = vmul.f32 %v1828_v15, %v678_v27 }
 0x10d   : > { %v2102_v56 = vadd.f32 %v723_v32, %v1876_v20  ;;  %v2105_v39 = vadd.f32 %v724_v52, %v1878_v44  ;;  %v2108_v13 = vadd.f32 %v733_v59, %v1973_v18  ;;  %v2111_v60 = vadd.f32 %v734_v61, %v1975_v29 }
 0x10e   : > { %v666_v46 = vpop.permute.xlu1 %665  ;;  %v686_v11 = vpop.permute.xlu0 %685 }
 0x10f   : > { %v727_v57 = vmul.f32 %v1825_v42, %v666_v46  ;;  %v728_v47 = vmul.f32 %v1828_v15, %v666_v46  ;;  %v737_v58 = vmul.f32 %v1825_v42, %v686_v11  ;;  %v738_v20 = vmul.f32 %v1828_v15, %v686_v11  ;;  %v2592_v46 = vld [vmem:[#allocation12_spill] sm:$0xff]  ;;  %v2593_v11 = vld [vmem:[#allocation13_spill] sm:$0xff] }
 0x111   : > { %v2118_v28 = vadd.f32 %v727_v57, %v1898_v45  ;;  %v2121_v44 = vadd.f32 %v728_v47, %v1900_v4  ;;  %v2124_v18 = vadd.f32 %v737_v58, %v1998_v48  ;;  %v2127_v29 = vadd.f32 %v738_v20, %v2000_v41 }
 0x112   : > { %v674_v35 = vpop.permute.xlu1 %673  ;;  %v694_v6 = vpop.permute.xlu0 %693 }
 0x113   : > { %v731_v16 = vmul.f32 %v1825_v42, %v674_v35  ;;  %v732_v23 = vmul.f32 %v1828_v15, %v674_v35  ;;  %v741_v55 = vmul.f32 %v1825_v42, %v694_v6  ;;  %v742_v45 = vmul.f32 %v1828_v15, %v694_v6 }
 0x115   : > { %v2134_v53 = vadd.f32 %v731_v16, %v1926_v2  ;;  %v2137_v4 = vadd.f32 %v732_v23, %v1929_v26  ;;  %v2140_v48 = vadd.f32 %v741_v55, %v2025_v31  ;;  %v2143_v41 = vadd.f32 %v742_v45, %v2027_v33 }
 0x116   : > { %v682_v19 = vpop.permute.xlu1 %681  ;;  %v702_v37 = vpop.permute.xlu0 %701 }
 0x117   : > { %v735_v5 = vmul.f32 %v1825_v42, %v682_v19  ;;  %v736_v49 = vmul.f32 %v1828_v15, %v682_v19  ;;  %v745_v17 = vmul.f32 %v1825_v42, %v702_v37  ;;  %v746_v2 = vmul.f32 %v1828_v15, %v702_v37 }
 0x119   : > { %v2150_v10 = vadd.f32 %v735_v5, %v1950_v25  ;;  %v2153_v26 = vadd.f32 %v736_v49, %v1953_v38  ;;  %v2156_v31 = vadd.f32 %v745_v17, %v2048_v43  ;;  %v2159_v33 = vadd.f32 %v746_v2, %v2050_v14  ;;  %v1321_v43 = vld [vmem:[%s2540_s1 + $0x4] ss:$8 sm:$0x3] }
 0x11a   : > { %v690_v24 = vpop.permute.xlu1 %689  ;;  %v2188_v57 = vrot.slane %v1321_v43, %v2593_v11 }
 0x11b   : > { %v739_v21 = vmul.f32 %v1825_v42, %v690_v24  ;;  %v740_v7 = vmul.f32 %v1828_v15, %v690_v24  ;;  %v2163_v27 = vpop.permute.xlu0 %786 }
 0x11d   : > { %v2166_v32 = vadd.f32 %v739_v21, %v1978_v3  ;;  %v2169_v25 = vadd.f32 %v740_v7, %v1981_v62  ;;  %v2185_v62 = vrot.slane %v1321_v43, %v2592_v46 }
 0x11e   : > { %v698_v38 = vpop.permute.xlu1 %697 }
 0x11f   : > { %v743_v14 = vmul.f32 %v1825_v42, %v698_v38  ;;  %v744_v52 = vmul.f32 %v1828_v15, %v698_v38  ;;  %v2176_v59 = vpop.permute.xlu0 %798 }
 0x121   : > { %v2179_v61 = vadd.f32 %v743_v14, %v2003_v0  ;;  %v2182_v3 = vadd.f32 %v744_v52, %v2006_v1 }
 0x123   : > { %v783_v47 = vpop.permute.xlu1 %782  ;;  %v2192_v15 = vpop.permute.xlu0 %806 }
 0x124   : > { %v856_v58 = vmul.f32 %v2185_v62, %v783_v47  ;;  %v857_v42 = vmul.f32 %v2188_v57, %v783_v47 }
 0x126   : > { %v2195_v20 = vadd.f32 %v856_v58, %v2030_v12  ;;  %v2198_v0 = vadd.f32 %v857_v42, %v2033_v22 }
 0x127   : > { %v791_v1 = vpop.permute.xlu1 %790  ;;  %v2202_v16 = vpop.permute.xlu0 %814 }
 0x128   : > { %v860_v35 = vmul.f32 %v2185_v62, %v791_v1  ;;  %v861_v6 = vmul.f32 %v2188_v57, %v791_v1 }
 0x12a   : > { %v2205_v23 = vadd.f32 %v860_v35, %v2086_v50  ;;  %v2208_v55 = vadd.f32 %v861_v6, %v2088_v34 }
 0x12b   : > { %v795_v45 = vpop.permute.xlu1 %794  ;;  %v2212_v22 = vpop.permute.xlu0 %822 }
 0x12c   : > { %v862_v12 = vmul.f32 %v2185_v62, %v795_v45  ;;  %v863_v19 = vmul.f32 %v2188_v57, %v795_v45 }
 0x12e   : > { %v2215_v37 = vadd.f32 %v862_v12, %v2057_v63  ;;  %v2218_v5 = vadd.f32 %v863_v19, %v2060_v54 }
 0x12f   : > { %v803_v49 = vpop.permute.xlu1 %802  ;;  %v2222_v34 = vpop.permute.xlu0 %830 }
 0x130   : > { %v866_v50 = vmul.f32 %v2185_v62, %v803_v49  ;;  %v867_v17 = vmul.f32 %v2188_v57, %v803_v49 }
 0x132   : > { %v2225_v2 = vadd.f32 %v866_v50, %v2076_v40  ;;  %v2228_v24 = vadd.f32 %v867_v17, %v2079_v30 }
 0x133   : > { %v811_v21 = vpop.permute.xlu1 %810  ;;  %v2232_v54 = vpop.permute.xlu0 %838 }
 0x134   : > { %v870_v63 = vmul.f32 %v2185_v62, %v811_v21  ;;  %v871_v7 = vmul.f32 %v2188_v57, %v811_v21 }
 0x136   : > { %v2235_v38 = vadd.f32 %v870_v63, %v2091_v8  ;;  %v2238_v43 = vadd.f32 %v871_v7, %v2094_v51 }
 0x137   : > { %v819_v14 = vpop.permute.xlu1 %818 }
 0x138   : > { %v874_v40 = vmul.f32 %v2185_v62, %v819_v14  ;;  %v875_v52 = vmul.f32 %v2188_v57, %v819_v14  ;;  %v2242_v30 = vpop.permute.xlu0 %923 }
 0x13a   : > { %v2245_v47 = vadd.f32 %v874_v40, %v2108_v13  ;;  %v2248_v58 = vadd.f32 %v875_v52, %v2111_v60 }
 0x13b   : > { %v827_v42 = vpop.permute.xlu1 %826 }
 0x13c   : > { %v878_v8 = vmul.f32 %v2185_v62, %v827_v42  ;;  %v879_v1 = vmul.f32 %v2188_v57, %v827_v42  ;;  %v2252_v51 = vpop.permute.xlu0 %935  ;;  %v1322_v42 = vld [vmem:[%s2540_s1 + $0x5] ss:$8 sm:$0x3] }
 0x13e   : > { %v2255_v35 = vadd.f32 %v878_v8, %v2124_v18  ;;  %v2258_v6 = vadd.f32 %v879_v1, %v2127_v29  ;;  %v858_v8 = vmul.f32 %v2185_v62, %v2163_v27  ;;  %v859_v1 = vmul.f32 %v2188_v57, %v2163_v27 }
 0x13f   : > { %v835_v45 = vpop.permute.xlu1 %834  ;;  %v864_v27 = vmul.f32 %v2185_v62, %v2176_v59 }
 0x140   : > { %2594 = vst [vmem:[#allocation14_spill] sm:$0xff] %v2255_v35  ;;  %2595 = vst [vmem:[#allocation5_spill] sm:$0xff] %v2258_v6  ;;  %v882_v13 = vmul.f32 %v2185_v62, %v835_v45  ;;  %v883_v12 = vmul.f32 %v2188_v57, %v835_v45  ;;  %v2262_v60 = vpop.permute.xlu0 %943  ;;  %v2299_v45 = vrot.slane %v1322_v42, %v2592_v46 }
 0x142   : > { %v2265_v19 = vadd.f32 %v882_v13, %v2140_v48  ;;  %v2268_v49 = vadd.f32 %v883_v12, %v2143_v41  ;;  %v2302_v13 = vrot.slane %v1322_v42, %v2593_v11  ;;  %v865_v42 = vmul.f32 %v2188_v57, %v2176_v59 }
 0x143   : > { %v843_v50 = vpop.permute.xlu1 %842  ;;  %v896_v59 = vadd.f32 %v864_v27, %v2102_v56  ;;  %v877_v27 = vmul.f32 %v2188_v57, %v2212_v22 }
 0x144   : > { %2596 = vst [vmem:[#allocation10_spill] sm:$0xff] %v2265_v19  ;;  %2597 = vst [vmem:[#allocation18_spill] sm:$0xff] %v2268_v49  ;;  %v886_v18 = vmul.f32 %v2185_v62, %v843_v50  ;;  %v887_v17 = vmul.f32 %v2188_v57, %v843_v50  ;;  %v2272_v29 = vpop.permute.xlu0 %951  ;;  %v891_v49 = vadd.f32 %v859_v1, %v2073_v9 }
 0x145   : > { %v869_v9 = vmul.f32 %v2188_v57, %v2192_v15 }
 0x146   : > { %v2275_v21 = vadd.f32 %v886_v18, %v2156_v31  ;;  %v2278_v63 = vadd.f32 %v887_v17, %v2159_v33  ;;  %v1323_v33 = vld [vmem:[%s2540_s1 + $0x6] ss:$8 sm:$0x3] }
 0x147   : > { %v2310_v17 = vrot.slane %v1323_v33, %v2592_v46 }
 0x148   : > { %2598 = vst [vmem:[#allocation17_spill] sm:$0xff] %v2275_v21  ;;  %2599 = vst [vmem:[#allocation6_spill] sm:$0xff] %v2278_v63  ;;  %v928_v7 = vpop.permute.xlu1 %927  ;;  %v2280_v48 = vpop.permute.xlu0 %959  ;;  %v2313_v63 = vrot.slane %v1323_v33, %v2593_v11 }
 0x149   : > { %v999_v50 = vmul.f32 %v2299_v45, %v928_v7  ;;  %v1000_v18 = vmul.f32 %v2302_v13, %v928_v7 }
 0x14b   : > { %v1032_v33 = vadd.f32 %v1000_v18, %v891_v49  ;;  %v876_v18 = vmul.f32 %v2185_v62, %v2212_v22 }
 0x14c   : > { %v2282_v14 = vpop.permute.xlu1 %931  ;;  %v2284_v41 = vpop.permute.xlu0 %967 }
 0x14d   : > { %2600 = vst [vmem:[#allocation11_spill] sm:$0xff] %v2284_v41 }
 0x150   : > { %v940_v40 = vpop.permute.xlu1 %939  ;;  %v2286_v52 = vpop.permute.xlu0 %975 }
 0x151   : > { %2601 = vst [vmem:[#allocation15_spill] sm:$0xff] %v2286_v52  ;;  %v1005_v7 = vmul.f32 %v2299_v45, %v940_v40  ;;  %v1006_v46 = vmul.f32 %v2302_v13, %v940_v40  ;;  %v897_v52 = vadd.f32 %v865_v42, %v2105_v39 }
 0x153   : > { %v1037_v41 = vadd.f32 %v1005_v7, %v896_v59 }
 0x154   : > { %v948_v31 = vpop.permute.xlu1 %947  ;;  %v2304_v12 = vpop.permute.xlu0 %983 }
 0x155   : > { %2602 = vst [vmem:[#allocation16_spill] sm:$0xff] %v2304_v12  ;;  %v890_v12 = vadd.f32 %v858_v8, %v2071_v36  ;;  %v868_v36 = vmul.f32 %v2185_v62, %v2192_v15 }
 0x157   : > { %v1031_v11 = vadd.f32 %v999_v50, %v890_v12  ;;  %v1038_v12 = vadd.f32 %v1006_v46, %v897_v52  ;;  %v1009_v50 = vmul.f32 %v2299_v45, %v948_v31  ;;  %v900_v15 = vadd.f32 %v868_v36, %v2118_v28 }
 0x158   : > { %v956_v21 = vpop.permute.xlu1 %955  ;;  %v873_v52 = vmul.f32 %v2188_v57, %v2202_v16  ;;  %v880_v28 = vmul.f32 %v2185_v62, %v2222_v34 }
 0x159   : > { %v1069_v19 = vpop.permute.xlu0 %1068  ;;  %v1013_v46 = vmul.f32 %v2299_v45, %v956_v21 }
 0x15a   : > { %v1140_v6 = vmul.f32 %v2310_v17, %v1069_v19  ;;  %v1141_v35 = vmul.f32 %v2313_v63, %v1069_v19  ;;  %v1010_v19 = vmul.f32 %v2302_v13, %v948_v31 }
 0x15c   : > { %v964_v8 = vpop.permute.xlu1 %963  ;;  %v1172_v1 = vadd.f32 %v1140_v6, %v1031_v11  ;;  %v1173_v40 = vadd.f32 %v1141_v35, %v1032_v33  ;;  %v901_v35 = vadd.f32 %v869_v9, %v2121_v44  ;;  %v872_v6 = vmul.f32 %v2185_v62, %v2202_v16 }
 0x15d   : > { %v1081_v49 = vpop.permute.xlu0 %1080  ;;  %v881_v44 = vmul.f32 %v2188_v57, %v2222_v34  ;;  %v1014_v11 = vmul.f32 %v2302_v13, %v956_v21  ;;  %v1041_v33 = vadd.f32 %v1009_v50, %v900_v15  ;;  %v905_v9 = vadd.f32 %v873_v52, %v2137_v4 }
 0x15e   : > { %1204 = vst [vmem:[%s2335_s29 + $0x10] sm:$0xff] %v1172_v1  ;;  %1205 = vst [vmem:[%s2335_s29 + $0x18] sm:$0xff] %v1173_v40  ;;  %v1146_v56 = vmul.f32 %v2310_v17, %v1081_v49  ;;  %v1147_v39 = vmul.f32 %v2313_v63, %v1081_v49  ;;  %v1042_v59 = vadd.f32 %v1010_v19, %v901_v35 }
 0x15f   : > { %v997_v34 = vmul.f32 %v2299_v45, %v2242_v30  ;;  %v998_v21 = vmul.f32 %v2302_v13, %v2242_v30  ;;  %v908_v40 = vadd.f32 %v876_v18, %v2150_v10  ;;  %v912_v19 = vadd.f32 %v880_v28, %v2166_v32 }
 0x160   : > { %v972_v31 = vpop.permute.xlu1 %971  ;;  %v1178_v42 = vadd.f32 %v1146_v56, %v1037_v41  ;;  %v1179_v7 = vadd.f32 %v1147_v39, %v1038_v12  ;;  %v904_v41 = vadd.f32 %v872_v6, %v2134_v53  ;;  %v909_v12 = vadd.f32 %v877_v27, %v2153_v26 }
 0x161   : > { %v1089_v16 = vpop.permute.xlu0 %1088  ;;  %v913_v53 = vadd.f32 %v881_v44, %v2169_v25  ;;  %v1046_v4 = vadd.f32 %v1014_v11, %v905_v9  ;;  %v1017_v15 = vmul.f32 %v2299_v45, %v964_v8  ;;  %v1018_v35 = vmul.f32 %v2302_v13, %v964_v8 }
 0x162   : > { %1210 = vst [vmem:[%s2335_s29 + $0x40] sm:$0xff] %v1178_v42  ;;  %1211 = vst [vmem:[%s2335_s29 + $0x48] sm:$0xff] %v1179_v7  ;;  %v1150_v36 = vmul.f32 %v2310_v17, %v1089_v16  ;;  %v1151_v22 = vmul.f32 %v2313_v63, %v1089_v16  ;;  %v1045_v56 = vadd.f32 %v1013_v46, %v904_v41 }
 0x163   : > { %v884_v26 = vmul.f32 %v2185_v62, %v2232_v54  ;;  %v885_v32 = vmul.f32 %v2188_v57, %v2232_v54  ;;  %v1029_v25 = vadd.f32 %v997_v34, %v2195_v20  ;;  %v1030_v6 = vadd.f32 %v998_v21, %v2198_v0 }
 0x164   : > { %v980_v1 = vpop.permute.xlu1 %979  ;;  %v1182_v49 = vadd.f32 %v1150_v36, %v1041_v33  ;;  %v1183_v50 = vadd.f32 %v1151_v22, %v1042_v59  ;;  %v1001_v8 = vmul.f32 %v2299_v45, %v2282_v14  ;;  %v1002_v52 = vmul.f32 %v2302_v13, %v2282_v14 }
 0x165   : > { %v1097_v39 = vpop.permute.xlu0 %1096  ;;  %v1021_v62 = vmul.f32 %v2299_v45, %v972_v31  ;;  %v1022_v7 = vmul.f32 %v2302_v13, %v972_v31  ;;  %v1049_v28 = vadd.f32 %v1017_v15, %v908_v40  ;;  %v1050_v0 = vadd.f32 %v1018_v35, %v909_v12 }
 0x166   : > { %1214 = vst [vmem:[%s2335_s29 + $0x60] sm:$0xff] %v1182_v49  ;;  %1215 = vst [vmem:[%s2335_s29 + $0x68] sm:$0xff] %v1183_v50  ;;  %v1154_v30 = vmul.f32 %v2310_v17, %v1097_v39  ;;  %v1155_v10 = vmul.f32 %v2313_v63, %v1097_v39  ;;  %v1003_v46 = vmul.f32 %v2299_v45, %v2252_v51 }
 0x167   : > { %v1004_v31 = vmul.f32 %v2302_v13, %v2252_v51  ;;  %v1033_v33 = vadd.f32 %v1001_v8, %v2205_v23  ;;  %v1034_v59 = vadd.f32 %v1002_v52, %v2208_v55  ;;  %v1053_v9 = vadd.f32 %v1021_v62, %v912_v19 }
 0x168   : > { %v1186_v18 = vadd.f32 %v1154_v30, %v1045_v56  ;;  %v1187_v27 = vadd.f32 %v1155_v10, %v1046_v4  ;;  %v1054_v34 = vadd.f32 %v1022_v7, %v913_v53  ;;  %v1025_v12 = vmul.f32 %v2299_v45, %v980_v1 }
 0x169   : > { %v1065_v42 = vpop.permute.xlu1 %1064  ;;  %v1026_v49 = vmul.f32 %v2302_v13, %v980_v1  ;;  %v916_v50 = vadd.f32 %v884_v26, %v2179_v61  ;;  %v917_v19 = vadd.f32 %v885_v32, %v2182_v3  ;;  %v1007_v4 = vmul.f32 %v2299_v45, %v2262_v60 }
 0x16a   : > { %v1138_v57 = vmul.f32 %v2310_v17, %v1065_v42  ;;  %v1139_v54 = vmul.f32 %v2313_v63, %v1065_v42  ;;  %v1105_v20 = vpop.permute.xlu0 %1104  ;;  %1218 = vst [vmem:[%s2335_s29 + $0x80] sm:$0xff] %v1186_v18  ;;  %1219 = vst [vmem:[%s2335_s29 + $0x88] sm:$0xff] %v1187_v27  ;;  %v1008_v1 = vmul.f32 %v2302_v13, %v2262_v60 }
 0x16b   : > { %v1158_v14 = vmul.f32 %v2310_v17, %v1105_v20  ;;  %v1159_v44 = vmul.f32 %v2313_v63, %v1105_v20  ;;  %v1035_v30 = vadd.f32 %v1003_v46, %v2215_v37  ;;  %v1036_v10 = vadd.f32 %v1004_v31, %v2218_v5 }
 0x16c   : > { %v1170_v11 = vadd.f32 %v1138_v57, %v1029_v25  ;;  %v1171_v16 = vadd.f32 %v1139_v54, %v1030_v6  ;;  %v1057_v32 = vadd.f32 %v1025_v12, %v916_v50  ;;  %v1058_v25 = vadd.f32 %v1026_v49, %v917_v19  ;;  %v2606_v12 = vld [vmem:[#allocation5_spill] sm:$0xff] }
 0x16d   : > { %v1190_v36 = vadd.f32 %v1158_v14, %v1049_v28  ;;  %v1191_v22 = vadd.f32 %v1159_v44, %v1050_v0  ;;  %v1073_v41 = vpop.permute.xlu1 %1072  ;;  %v1039_v8 = vadd.f32 %v1007_v4, %v2225_v2  ;;  %v1040_v52 = vadd.f32 %v1008_v1, %v2228_v24  ;;  %v2608_v4 = vld [vmem:[#allocation18_spill] sm:$0xff] }
 0x16e   : > { %1202 = vst [vmem:[%s2335_s29] sm:$0xff] %v1170_v11  ;;  %1203 = vst [vmem:[%s2335_s29 + $0x8] sm:$0xff] %v1171_v16  ;;  %v1142_v21 = vmul.f32 %v2310_v17, %v1073_v41  ;;  %v1143_v40 = vmul.f32 %v2313_v63, %v1073_v41  ;;  %v1113_v51 = vpop.permute.xlu0 %1112  ;;  %v1011_v62 = vmul.f32 %v2299_v45, %v2272_v29 }
 0x16f   : > { %1222 = vst [vmem:[%s2335_s29 + $0xa0] sm:$0xff] %v1190_v36  ;;  %1223 = vst [vmem:[%s2335_s29 + $0xa8] sm:$0xff] %v1191_v22  ;;  %v1162_v23 = vmul.f32 %v2310_v17, %v1113_v51  ;;  %v1163_v55 = vmul.f32 %v2313_v63, %v1113_v51  ;;  %v1012_v7 = vmul.f32 %v2302_v13, %v2272_v29 }
 0x170   : > { %v1174_v53 = vadd.f32 %v1142_v21, %v1033_v33  ;;  %v1175_v56 = vadd.f32 %v1143_v40, %v1034_v59  ;;  %v1015_v20 = vmul.f32 %v2299_v45, %v2280_v48  ;;  %v1016_v28 = vmul.f32 %v2302_v13, %v2280_v48  ;;  %v2603_v59 = vld [vmem:[#allocation11_spill] sm:$0xff]  ;;  %v2605_v40 = vld [vmem:[#allocation14_spill] sm:$0xff] }
 0x171   : > { %v1194_v39 = vadd.f32 %v1162_v23, %v1053_v9  ;;  %v1195_v15 = vadd.f32 %v1163_v55, %v1054_v34  ;;  %v1077_v35 = vpop.permute.xlu1 %1076  ;;  %v1043_v29 = vadd.f32 %v1011_v62, %v2235_v38  ;;  %v1044_v14 = vadd.f32 %v1012_v7, %v2238_v43 }
 0x172   : > { %1206 = vst [vmem:[%s2335_s29 + $0x20] sm:$0xff] %v1174_v53  ;;  %1207 = vst [vmem:[%s2335_s29 + $0x28] sm:$0xff] %v1175_v56  ;;  %v1144_v61 = vmul.f32 %v2310_v17, %v1077_v35  ;;  %v1145_v3 = vmul.f32 %v2313_v63, %v1077_v35  ;;  %v1121_v26 = vpop.permute.xlu0 %1120  ;;  %v1047_v16 = vadd.f32 %v1015_v20, %v2245_v47  ;;  %v2604_v47 = vld [vmem:[#allocation15_spill] sm:$0xff]  ;;  %v2607_v53 = vld [vmem:[#allocation10_spill] sm:$0xff] }
 0x173   : > { %1226 = vst [vmem:[%s2335_s29 + $0xc0] sm:$0xff] %v1194_v39  ;;  %1227 = vst [vmem:[%s2335_s29 + $0xc8] sm:$0xff] %v1195_v15  ;;  %v1166_v60 = vmul.f32 %v2310_v17, %v1121_v26  ;;  %v1167_v37 = vmul.f32 %v2313_v63, %v1121_v26  ;;  %v1048_v33 = vadd.f32 %v1016_v28, %v2248_v58  ;;  %v2609_v15 = vld [vmem:[#allocation16_spill] sm:$0xff] }
 0x174   : > { %v1176_v5 = vadd.f32 %v1144_v61, %v1035_v30  ;;  %v1177_v6 = vadd.f32 %v1145_v3, %v1036_v10  ;;  %v1019_v38 = vmul.f32 %v2299_v45, %v2603_v59  ;;  %v1020_v43 = vmul.f32 %v2302_v13, %v2603_v59 }
 0x175   : > { %v1198_v18 = vadd.f32 %v1166_v60, %v1057_v32  ;;  %v1199_v27 = vadd.f32 %v1167_v37, %v1058_v25  ;;  %v1085_v42 = vpop.permute.xlu1 %1084  ;;  %v1023_v34 = vmul.f32 %v2299_v45, %v2604_v47  ;;  %v1024_v58 = vmul.f32 %v2302_v13, %v2604_v47  ;;  %v2610_v25 = vld [vmem:[#allocation17_spill] sm:$0xff]  ;;  %v2611_v60 = vld [vmem:[#allocation6_spill] sm:$0xff] }
 0x176   : > { %1208 = vst [vmem:[%s2335_s29 + $0x30] sm:$0xff] %v1176_v5  ;;  %1209 = vst [vmem:[%s2335_s29 + $0x38] sm:$0xff] %v1177_v6  ;;  %v1148_v57 = vmul.f32 %v2310_v17, %v1085_v42  ;;  %v1149_v54 = vmul.f32 %v2313_v63, %v1085_v42  ;;  %v1051_v51 = vadd.f32 %v1019_v38, %v2605_v40 }
 0x177   : > { %1230 = vst [vmem:[%s2335_s29 + $0xe0] sm:$0xff] %v1198_v18  ;;  %1231 = vst [vmem:[%s2335_s29 + $0xe8] sm:$0xff] %v1199_v27  ;;  %v1052_v49 = vadd.f32 %v1020_v43, %v2606_v12  ;;  %v1055_v56 = vadd.f32 %v1023_v34, %v2607_v53  ;;  %v1056_v1 = vadd.f32 %v1024_v58, %v2608_v4 }
 0x178   : > { %v1180_v2 = vadd.f32 %v1148_v57, %v1039_v8  ;;  %v1181_v24 = vadd.f32 %v1149_v54, %v1040_v52  ;;  %v1027_v35 = vmul.f32 %v2299_v45, %v2609_v15  ;;  %v1028_v30 = vmul.f32 %v2302_v13, %v2609_v15 }
 0x179   : > { %v1093_v0 = vpop.permute.xlu1 %1092 }
 0x17a   : > { %1212 = vst [vmem:[%s2335_s29 + $0x50] sm:$0xff] %v1180_v2  ;;  %1213 = vst [vmem:[%s2335_s29 + $0x58] sm:$0xff] %v1181_v24  ;;  %v1152_v44 = vmul.f32 %v2310_v17, %v1093_v0  ;;  %v1153_v46 = vmul.f32 %v2313_v63, %v1093_v0  ;;  %v1059_v45 = vadd.f32 %v1027_v35, %v2610_v25 }
 0x17b   : > { %v1060_v37 = vadd.f32 %v1028_v30, %v2611_v60 }
 0x17c   : > { %v1184_v31 = vadd.f32 %v1152_v44, %v1043_v29  ;;  %v1185_v11 = vadd.f32 %v1153_v46, %v1044_v14 }
 0x17d   : > { %v1101_v48 = vpop.permute.xlu1 %1100 }
 0x17e   : > { %1216 = vst [vmem:[%s2335_s29 + $0x70] sm:$0xff] %v1184_v31  ;;  %1217 = vst [vmem:[%s2335_s29 + $0x78] sm:$0xff] %v1185_v11  ;;  %v1156_v36 = vmul.f32 %v2310_v17, %v1101_v48  ;;  %v1157_v22 = vmul.f32 %v2313_v63, %v1101_v48 }
 0x180   : > { %v1188_v41 = vadd.f32 %v1156_v36, %v1047_v16  ;;  %v1189_v9 = vadd.f32 %v1157_v22, %v1048_v33 }
 0x181   : > { %v1109_v21 = vpop.permute.xlu1 %1108 }
 0x182   : > { %1220 = vst [vmem:[%s2335_s29 + $0x90] sm:$0xff] %v1188_v41  ;;  %1221 = vst [vmem:[%s2335_s29 + $0x98] sm:$0xff] %v1189_v9  ;;  %v1160_v23 = vmul.f32 %v2310_v17, %v1109_v21  ;;  %v1161_v55 = vmul.f32 %v2313_v63, %v1109_v21 }
 0x184   : > { %v1192_v50 = vadd.f32 %v1160_v23, %v1051_v51  ;;  %v1193_v19 = vadd.f32 %v1161_v55, %v1052_v49 }
 0x185   : > { %v1117_v39 = vpop.permute.xlu1 %1116 }
 0x186   : > { %1224 = vst [vmem:[%s2335_s29 + $0xb0] sm:$0xff] %v1192_v50  ;;  %1225 = vst [vmem:[%s2335_s29 + $0xb8] sm:$0xff] %v1193_v19  ;;  %v1164_v10 = vmul.f32 %v2310_v17, %v1117_v39  ;;  %v1165_v61 = vmul.f32 %v2313_v63, %v1117_v39 }
 0x188   : > { %v1196_v3 = vadd.f32 %v1164_v10, %v1055_v56  ;;  %v1197_v26 = vadd.f32 %v1165_v61, %v1056_v1 }
 0x189   : > { %v1125_v32 = vpop.permute.xlu1 %1124 }
 0x18a   : > { %1228 = vst [vmem:[%s2335_s29 + $0xd0] sm:$0xff] %v1196_v3  ;;  %1229 = vst [vmem:[%s2335_s29 + $0xd8] sm:$0xff] %v1197_v26  ;;  %v1168_v13 = vmul.f32 %v2310_v17, %v1125_v32  ;;  %v1169_v5 = vmul.f32 %v2313_v63, %v1125_v32 }
 0x18c   : > { %v1200_v6 = vadd.f32 %v1168_v13, %v1059_v45  ;;  %v1201_v8 = vadd.f32 %v1169_v5, %v1060_v37 }
 0x18e   : > { %1232 = vst [vmem:[%s2335_s29 + $0xf0] sm:$0xff] %v1200_v6  ;;  %1233 = vst [vmem:[%s2335_s29 + $0xf8] sm:$0xff] %v1201_v8 }
 0x18f   : > { %1407 = shalt.err (!%p1404_p3)
}
 0x190   : > { %s1408_s17 = scalar_lea.hbm %s2490_s7, 4096  ;;  %s1412_s24 = scalar_lea.hbm %s2542_s3, 8192 }
 0x191   : > { %p1409_p4 = scmp.ne.s32.totalorder %s2490_s7, %s1408_s17  ;;  %p1413_p9 = scmp.lt.u32.totalorder %s2490_s7, %s2542_s3 }
 0x192   : > { %p1414_p10 = scmp.lt.u32.totalorder %s1412_s24, %s1408_s17  ;;  %p1416_p12 = scmp.lt.u32.totalorder %s1408_s17, %s2490_s7 }
 0x193   : > { %p1410_p7 = pnand %p1409_p4, %p1526_p5 }
 0x194   : > { %p1415_p11 = por %p1414_p10, %p1413_p9 }
 0x195   : > { %p1411_p8 = pneg %p1410_p7 }
 0x196   : > { %p1417_p13 = por %p1416_p12, %p1415_p11 }
 0x198   : > { %p1418_p0 = pnand %p1417_p13, %p1411_p8 }
 0x19a   : > { %1421 = shalt.err (!%p1418_p0)
}
 0x19b   : > { %s1466_s27 = smov 256   ;;  %s1467_s28 = smov 16  }
 0x19c   : > { %1332 = dma.vmem_to_hbm [thread:$0]  (%p1526_p5), %s2492_s4, 4096, %s2490_s7, %s2498_s16, %s1466_s27, %s1466_s27, %s1467_s28  }
 0x19d PF: > { %p1338_p1 = scmp.ge.s32.totalorder %s1456_s15, 2  ;;  %s1264_s29 = sand.u32 1, %s1444_s12  }
 0x19e   : > { %s1265_s30 = scalar_lea.sflag [#allocation3], %s1264_s29 }
 0x19f   : > { %p1335_p2 = pnand %p1338_p1, %p1530_p6 }
 0x1a1   : > { %1439 = dma.done.wait (!%p1335_p2), %s1265_s30, 4096  }
 0x1a2   : > { %1441 = vsyncadd (!%p1335_p2), %s1265_s30, 4294963200  ;;  %p13_p3 = scmp.ge.s32.totalorder %s1513_s18, 4   ;;  %s2612_s12 = smov %s1448_s13 }
 0x1a3   : > { %s2613_s13 = smov %s1452_s14  ;;  %s2614_s14 = smov %s1524_s21 }
 0x1a4   : > { %s2615_s15 = smov %s1513_s18  ;;  %15 = sbr.rel (!%p13_p3) target bundleno = 3 (0x3), region = 73 }
 0x1ab   :  { %1270 = vsyncpa [#allocation3], 1 }
 0x1ac   :  { %1272 = vsyncpa [#allocation3 + $0x1], 1 }

</bundles_post_ra>
